<compile_context>
chip_gen: v5e
topology: v5e:2x2
jax: 0.10.0
libtpu: 0.0.40
codegen_flags: <defaults>
</compile_context>

<pallas_src>
import jax
import jax.numpy as jnp
from jax.experimental import pallas as pl
from jax.experimental.pallas import tpu as pltpu


def _patch_embed_kernel(xp_ref, w_ref, b_ref, o_ref):
    """One (batch, lane-tile) step: o[0] = W @ xp[0] + bias."""
    # xp_ref: (1, K, jt)   w_ref: (E, K)   b_ref: (E, 1)   o_ref: (1, E, jt)
    acc = jnp.dot(w_ref[...], xp_ref[0], preferred_element_type=jnp.float32)
    o_ref[0] = (acc + b_ref[...]).astype(o_ref.dtype)


def conv_patch_embed_forward(x, weight, bias, *, max_lane_block=4096):
    """x: (B, C, H, W); weight: (E, C, kh, kw) PyTorch Conv2d layout; bias: (E,)."""
    B, C, H, W = x.shape
    E, Cw, kh, kw = weight.shape
    assert Cw == C and H % kh == 0 and W % kw == 0
    Ph, Pw = H // kh, W // kw
    J = Ph * Pw                      # patches per image (output lane axis)
    K = C * kh * kw                  # contraction dim

    # im2col for stride == kernel, no padding.  K ordered (c, i, j) to match the
    # Conv2d weight flattening; patches land lane-major so the kernel output is
    # already in NCHW order (pure layout plumbing in the wrapper).
    xp = x.reshape(B, C, Ph, kh, Pw, kw).transpose(0, 1, 3, 5, 2, 4).reshape(B, K, J)
    w2 = weight.reshape(E, K)        # (E, K)
    b2 = bias.reshape(E, 1)          # (E, 1) broadcasts over lanes

    # Lane-tile selection: whole image per step unless J is huge, in which case
    # use the largest multiple-of-128 divisor of J (fall back to full J).
    if J <= max_lane_block:
        jt = J
    else:
        jt = J
        for cand in range(max_lane_block - max_lane_block % 128, 0, -128):
            if J % cand == 0:
                jt = cand
                break
    n_j = J // jt

    cost = pl.CostEstimate(
        flops=2 * B * J * K * E,
        transcendentals=0,
        bytes_accessed=4 * (B * K * J + E * K + E + B * E * J),
    )

    out = pl.pallas_call(
        _patch_embed_kernel,
        out_shape=jax.ShapeDtypeStruct((B, E, J), x.dtype),
        grid=(B, n_j),
        in_specs=[
            pl.BlockSpec((1, K, jt), lambda b, j: (b, 0, j)),  # patches (tiled)
            pl.BlockSpec((E, K), lambda b, j: (0, 0)),         # weight (resident)
            pl.BlockSpec((E, 1), lambda b, j: (0, 0)),         # bias (resident)
        ],
        out_specs=pl.BlockSpec((1, E, jt), lambda b, j: (b, 0, j)),
        compiler_params=pltpu.CompilerParams(
            dimension_semantics=("parallel", "parallel")),
        cost_estimate=cost,
    )(xp, w2, b2)

    # (B, E, Ph*Pw) -> (B, E, Ph, Pw): free reshape, matches PyTorch Conv2d NCHW.
    return out.reshape(B, E, Ph, Pw)


def _reference_forward(x, weight, bias):
    """Pure-JAX mirror of the PyTorch forward (strided conv) for verification."""
    kh, kw = weight.shape[2], weight.shape[3]
    out = jax.lax.conv_general_dilated(
        x, weight,
        window_strides=(kh, kw),
        padding="VALID",
        dimension_numbers=("NCHW", "OIHW", "NCHW"),
        precision=jax.lax.Precision.HIGHEST)
    return out + bias.reshape(1, -1, 1, 1)


if __name__ == "__main__":
    # Small shapes consistent with the module: in_chans=3, embed_dim=128,
    # conv kernel/stride = patch_size // inner_patches = 16 // 4 = 4.
    # B=2 images of 32x32 -> 8x8 = 64 patches each.
    B, C, H, W = 2, 3, 32, 32
    embed_dim = 128
    kh = kw = 4

    key = jax.random.PRNGKey(0)
    kx, kwgt, kb = jax.random.split(key, 3)
    x = jax.random.normal(kx, (B, C, H, W), dtype=jnp.float32)
    weight = 0.05 * jax.random.normal(kwgt, (embed_dim, C, kh, kw), dtype=jnp.float32)
    bias = 0.05 * jax.random.normal(kb, (embed_dim,), dtype=jnp.float32)

    out = conv_patch_embed_forward(x, weight, bias)
    out = jax.block_until_ready(out)
    assert out.shape == (B, embed_dim, H // kh, W // kw)

    ref = _reference_forward(x, weight, bias)
    assert jnp.allclose(out, ref, atol=2e-3, rtol=2e-3), "mismatch vs JAX reference"

    print("KERNEL_OK")
</pallas_src>

<mosaic_0001>
module attributes {stable_mosaic.version = 11 : i64} {
  func.func @_patch_embed_kernel(%arg0: i32, %arg1: i32, %arg2: memref<1x48x64xf32, #tpu.memory_space<vmem>>, %arg3: memref<128x48xf32, #tpu.memory_space<vmem>>, %arg4: memref<128x1xf32, #tpu.memory_space<vmem>>, %arg5: memref<1x128x64xf32, #tpu.memory_space<vmem>>) attributes {dimension_semantics = [#tpu.dimension_semantics<parallel>, #tpu.dimension_semantics<parallel>], iteration_bounds = array<i64: 2, 1>, scalar_prefetch = 0 : i64, scratch_operands = 0 : i64, tpu.core_type = #tpu.core_type<tc>, window_params = [{transform_indices = @transform_0, window_bounds = array<i64: 1, 48, 64>}, {pipeline_mode = #tpu.pipeline_mode<synchronous>, transform_indices = @transform_1, window_bounds = array<i64: 128, 48>}, {pipeline_mode = #tpu.pipeline_mode<synchronous>, transform_indices = @transform_2, window_bounds = array<i64: 128, 1>}, {transform_indices = @transform_3, window_bounds = array<i64: 1, 128, 64>}]} {
    %c0 = arith.constant 0 : index
    %c0_0 = arith.constant 0 : index
    %0 = vector.load %arg3[%c0, %c0_0] : memref<128x48xf32, #tpu.memory_space<vmem>>, vector<128x48xf32>
    %c0_1 = arith.constant 0 : index
    %c0_2 = arith.constant 0 : index
    %c0_3 = arith.constant 0 : index
    %1 = vector.load %arg2[%c0_1, %c0_2, %c0_3] : memref<1x48x64xf32, #tpu.memory_space<vmem>>, vector<1x48x64xf32>
    %2 = vector.shape_cast %1 : vector<1x48x64xf32> to vector<48x64xf32>
    %cst = arith.constant dense<0.000000e+00> : vector<128x64xf32>
    %3 = tpu.matmul %0, %2, %cst {dimension_numbers = #tpu.dot_dimension_numbers<[1], [0], [0], [1], [0, 0, 1, 1], [], []>} : vector<128x48xf32>, vector<48x64xf32>, vector<128x64xf32> -> vector<128x64xf32>
    %c0_4 = arith.constant 0 : index
    %c0_5 = arith.constant 0 : index
    %4 = vector.load %arg4[%c0_4, %c0_5] : memref<128x1xf32, #tpu.memory_space<vmem>>, vector<128x1xf32>
    %5 = vector.broadcast %4 : vector<128x1xf32> to vector<128x64xf32>
    %6 = arith.addf %3, %5 : vector<128x64xf32>
    %c0_6 = arith.constant 0 : index
    %c0_7 = arith.constant 0 : index
    %c0_8 = arith.constant 0 : index
    %7 = vector.load %arg5[%c0_6, %c0_7, %c0_8] : memref<1x128x64xf32, #tpu.memory_space<vmem>>, vector<1x128x64xf32>
    %8 = vector.shape_cast %7 : vector<1x128x64xf32> to vector<128x64xf32>
    %9 = vector.shape_cast %6 : vector<128x64xf32> to vector<1x128x64xf32>
    tpu.vector_store %arg5[%c0_6, %c0_7, %c0_8], %9 {strides = array<i32>} : memref<1x128x64xf32, #tpu.memory_space<vmem>>, vector<1x128x64xf32>,
    return
  }
  func.func @transform_0(%arg0: i32, %arg1: i32) -> (i32, i32, i32) {
    %c0_i32 = arith.constant 0 : i32
    %c0_i32_0 = arith.constant 0 : i32
    return %arg0, %c0_i32, %arg1 : i32, i32, i32
  }
  func.func @transform_1(%arg0: i32, %arg1: i32) -> (i32, i32) {
    %c0_i32 = arith.constant 0 : i32
    %c0_i32_0 = arith.constant 0 : i32
    %c0_i32_1 = arith.constant 0 : i32
    return %c0_i32, %c0_i32_0 : i32, i32
  }
  func.func @transform_2(%arg0: i32, %arg1: i32) -> (i32, i32) {
    %c0_i32 = arith.constant 0 : i32
    %c0_i32_0 = arith.constant 0 : i32
    %c0_i32_1 = arith.constant 0 : i32
    return %c0_i32, %c0_i32_0 : i32, i32
  }
  func.func @transform_3(%arg0: i32, %arg1: i32) -> (i32, i32, i32) {
    %c0_i32 = arith.constant 0 : i32
    %c0_i32_0 = arith.constant 0 : i32
    return %arg0, %c0_i32, %arg1 : i32, i32, i32
  }
}

</mosaic_0001>

<bundles_post_ra>
// kernel: tpu_custom_call.1
= control target key start
LH: loop header
LB: loop body
LE: loop exit
PB: predicated region body
PF: predicated region fallthrough
CT: control target
= control target key end

     0   :  { %s653_s12 = smov 0   ;;  %s655_s13 = smov 0   ;;  %s836_s0 = inlined_call_operand.vmem [shape: f32[2,48,64], index: 0, kind: input, shape index: {}]   ;;  %s837_s1 = inlined_call_operand.vmem [shape: f32[128,48], index: 1, kind: input, shape index: {}]   ;;  %s838_s2 = inlined_call_operand.vmem [shape: f32[128,1], index: 2, kind: input, shape index: {}]   ;;  %s839_s3 = inlined_call_operand.vmem [shape: f32[2,128,64], index: 3, kind: output, shape index: {}]  }
   0x1   :  { %s657_s14 = smov 0  }
   0x2 LB: > { %s25_s15 = sadd.s32 1, %s626_s13  ;;  %p538_p0 = scmp.ge.s32.totalorder %s630_s14, 1  ;;  %s630_s14 = sphi %s657_s14, %s13_s14   ;;  %s626_s13 = sphi %s655_s13, %s841_s13   ;;  %s622_s12 = sphi %s653_s12, %s840_s12  }
   0x3   : > { %p27_p1 = scmp.ge.s32.totalorder %s25_s15, 2  ;;  %p156_p2 = scmp.lt.s32.totalorder %s630_s14, 3 }
   0x5   : > { %s843_s15 = smov (%p27_p1, %s25_s15), 0  ;;  %p157_p3 = pnand %p538_p0, %p156_p2 }
   0x6   : > { %p186_p4 = scmp.lt.s32.totalorder (!%p157_p3), %s622_s12, 1 }
   0x7   : > { %160 = sbr.rel (%p157_p3) target bundleno = 192 (0xc0), region = 32 }
   0xc   : > { %v226_v0 = vld [vmem:[%s838_s2 + $0x10] sm:$0xff]  ;;  %v224_v1 = vld [vmem:[%s838_s2] sm:$0xff]  ;;  %v632_v2 = vmov 0   ;;  %s845_s12 = smov (!%p186_p4, %s622_s12), 1  ;;  %v227_v5 = vld [vmem:[%s838_s2 + $0x18] sm:$0xff]  ;;  %vm320_vm0 = vcmask 392192  }
   0xd   : > { %606 = vset.pattern.permute.xlu1 %v632_v2  ;;  %605 = vset.pattern.permute.xlu0 %v632_v2  ;;  %v228_v3 = vld [vmem:[%s838_s2 + $0x20] sm:$0xff]  ;;  %s579_s22 = smul.u32 48, %s845_s12  ;;  %v225_v6 = vld [vmem:[%s838_s2 + $0x8] sm:$0xff]  ;;  %v231_v11 = vld [vmem:[%s838_s2 + $0x38] sm:$0xff]  ;;  %s560_s11 = sshll.u32 %s845_s12, 7  ;;  %vm434_vm1 = vcmask 523264  }
   0xe   : > { %252 = vperm.xlu1 %606, %v226_v0   ;;  %242 = vperm.xlu0 %605, %v224_v1   ;;  %v230_v12 = vld [vmem:[%s838_s2 + $0x30] sm:$0xff]  ;;  %v202_v14 = vld [vmem:[%s837_s1] sm:$0xff]  ;;  %v229_v18 = vld [vmem:[%s838_s2 + $0x28] sm:$0xff]  ;;  %s793_s18 = scalar_lea.vmem %s839_s3, %s560_s11 }
   0xf   : > { %607 = vset.pattern.permute.xlu2 %v632_v2  ;;  %s193_s25 = scalar_lea.vmem %s836_s0, %s579_s22  ;;  %v206_v15 = vld [vmem:[%s837_s1 + $0x20] sm:$0xff]  ;;  %v234_v19 = vld [vmem:[%s838_s2 + $0x50] sm:$0xff]  ;;  %v233_v20 = vld [vmem:[%s838_s2 + $0x48] sm:$0xff] }
  0x10   : > { %262 = vperm.xlu2 %607, %v228_v3   ;;  %v223_v4 = vld [vmem:[%s193_s25 + $0x28] sm:$0xff]  ;;  %v222_v7 = vld [vmem:[%s193_s25 + $0x20] sm:$0xff]  ;;  %v221_v8 = vld [vmem:[%s193_s25 + $0x18] sm:$0xff] }
  0x11   : > { %379 = vmatpush.msra.mxu0 %v223_v4  ;;  %561 = vmatpush.msra.mxu1 %v223_v4  ;;  %v220_v9 = vld [vmem:[%s193_s25 + $0x10] sm:$0xff]  ;;  %v219_v10 = vld [vmem:[%s193_s25 + $0x8] sm:$0xff]  ;;  %v218_v13 = vld [vmem:[%s193_s25] sm:$0xff] }
  0x12   : > { %562 = vmatpush.msra.mxu2 %v223_v4  ;;  %563 = vmatpush.msra.mxu3 %v223_v4  ;;  %v210_v16 = vld [vmem:[%s837_s1 + $0x40] sm:$0xff]  ;;  %v203_v21 = vld [vmem:[%s837_s1 + $0x8] sm:$0xff]  ;;  %v204_v28 = vld [vmem:[%s837_s1 + $0x10] sm:$0xff] }
  0x13   : > { %380 = vmatpush.msra.mxu0 %v222_v7  ;;  %564 = vmatpush.msra.mxu1 %v222_v7  ;;  %v214_v17 = vld [vmem:[%s837_s1 + $0x60] sm:$0xff]  ;;  %v207_v22 = vld [vmem:[%s837_s1 + $0x28] sm:$0xff]  ;;  %v208_v29 = vld [vmem:[%s837_s1 + $0x30] sm:$0xff] }
  0x14   : > { %565 = vmatpush.msra.mxu2 %v222_v7  ;;  %566 = vmatpush.msra.mxu3 %v222_v7  ;;  %v211_v23 = vld [vmem:[%s837_s1 + $0x48] sm:$0xff]  ;;  %v232_v25 = vld [vmem:[%s838_s2 + $0x40] sm:$0xff]  ;;  %v212_v30 = vld [vmem:[%s837_s1 + $0x50] sm:$0xff] }
  0x15   : > { %381 = vmatpush.msra.mxu0 %v221_v8  ;;  %567 = vmatpush.msra.mxu1 %v221_v8  ;;  %v215_v24 = vld [vmem:[%s837_s1 + $0x68] sm:$0xff]  ;;  %v236_v27 = vld [vmem:[%s838_s2 + $0x60] sm:$0xff]  ;;  %v216_v31 = vld [vmem:[%s837_s1 + $0x70] sm:$0xff] }
  0x16   : > { %257 = vperm.xlu1 %606, %v227_v5   ;;  %247 = vperm.xlu0 %605, %v225_v6   ;;  %v237_v26 = vld [vmem:[%s838_s2 + $0x68] sm:$0xff]  ;;  %v235_v32 = vld [vmem:[%s838_s2 + $0x58] sm:$0xff]  ;;  %v238_v38 = vld [vmem:[%s838_s2 + $0x70] sm:$0xff] }
  0x17   : > { %568 = vmatpush.msra.mxu2 %v221_v8  ;;  %569 = vmatpush.msra.mxu3 %v221_v8  ;;  %v239_v33 = vld [vmem:[%s838_s2 + $0x78] sm:$0xff] }
  0x18   : > { %382 = vmatpush.msra.mxu0 %v220_v9  ;;  %570 = vmatpush.msra.mxu1 %v220_v9  ;;  %v205_v34 = vld [vmem:[%s837_s1 + $0x18] sm:$0xff] }
  0x19   : > { %571 = vmatpush.msra.mxu2 %v220_v9  ;;  %572 = vmatpush.msra.mxu3 %v220_v9  ;;  %v209_v35 = vld [vmem:[%s837_s1 + $0x38] sm:$0xff] }
  0x1a   : > { %383 = vmatpush.msra.mxu0 %v219_v10  ;;  %573 = vmatpush.msra.mxu1 %v219_v10  ;;  %v213_v36 = vld [vmem:[%s837_s1 + $0x58] sm:$0xff] }
  0x1b   : > { %574 = vmatpush.msra.mxu2 %v219_v10  ;;  %575 = vmatpush.msra.mxu3 %v219_v10  ;;  %v217_v37 = vld [vmem:[%s837_s1 + $0x78] sm:$0xff] }
  0x1c   : > { %384 = vmatpush.msra.mxu0 %v218_v13  ;;  %576 = vmatpush.msra.mxu1 %v218_v13 }
  0x1d   : > { %577 = vmatpush.msra.mxu2 %v218_v13  ;;  %578 = vmatpush.msra.mxu3 %v218_v13 }
  0x1e   : > { %277 = vperm.xlu1 %606, %v231_v11   ;;  %272 = vperm.xlu0 %605, %v230_v12  }
  0x1f   : > { %542 = vmatmul.msk.f32.vlgmr.msra.gmra.mxu0 %vm320_vm0, %v202_v14  ;;  %546 = vmatmul.msk.f32.vlgmr.msra.gmra.mxu1 %vm320_vm0, %v206_v15 }
  0x20   : > { %550 = vmatmul.msk.f32.vlgmr.msra.gmra.mxu2 %vm320_vm0, %v210_v16  ;;  %554 = vmatmul.msk.f32.vlgmr.msra.gmra.mxu3 %vm320_vm0, %v214_v17 }
  0x21   : > { %267 = vperm.xlu2 %607, %v229_v18  }
  0x26   : > { %292 = vperm.xlu1 %606, %v234_v19   ;;  %287 = vperm.xlu0 %605, %v233_v20  }
  0x27   : > { %543 = vmatmul.msk.f32.gmra.mxu0 %vm320_vm0, %v203_v21  ;;  %547 = vmatmul.msk.f32.gmra.mxu1 %vm320_vm0, %v207_v22 }
  0x28   : > { %551 = vmatmul.msk.f32.gmra.mxu2 %vm320_vm0, %v211_v23  ;;  %555 = vmatmul.msk.f32.gmra.mxu3 %vm320_vm0, %v215_v24 }
  0x29   : > { %282 = vperm.xlu2 %607, %v232_v25  }
  0x2e   : > { %307 = vperm.xlu1 %606, %v237_v26   ;;  %302 = vperm.xlu0 %605, %v236_v27  }
  0x2f   : > { %544 = vmatmul.msk.f32.gmra.mxu0 %vm320_vm0, %v204_v28  ;;  %548 = vmatmul.msk.f32.gmra.mxu1 %vm320_vm0, %v208_v29 }
  0x30   : > { %552 = vmatmul.msk.f32.gmra.mxu2 %vm320_vm0, %v212_v30  ;;  %556 = vmatmul.msk.f32.gmra.mxu3 %vm320_vm0, %v216_v31 }
  0x31   : > { %297 = vperm.xlu2 %607, %v235_v32  }
  0x36   : > { %317 = vperm.xlu0 %605, %v239_v33  }
  0x37   : > { %545 = vmatmul.msk.f32.gmra.mxu0 %vm320_vm0, %v205_v34  ;;  %549 = vmatmul.msk.f32.gmra.mxu1 %vm320_vm0, %v209_v35 }
  0x38   : > { %553 = vmatmul.msk.f32.gmra.mxu2 %vm320_vm0, %v213_v36  ;;  %557 = vmatmul.msk.f32.gmra.mxu3 %vm320_vm0, %v217_v37 }
  0x39   : > { %312 = vperm.xlu2 %607, %v238_v38  }
  0x6a   : > { %v263_v42 = vpop.permute.xlu2 %262 }
  0x7b   : > { %v268_v45 = vpop.permute.xlu2 %267 }
  0x80   : > { %v243_v39 = vpop.permute.xlu0 %242  ;;  %v253_v40 = vpop.permute.xlu1 %252 }
  0x83   : > { %v283_v52 = vpop.permute.xlu2 %282 }
  0x88   : > { %v248_v41 = vpop.permute.xlu0 %247  ;;  %v258_v43 = vpop.permute.xlu1 %257 }
  0x8b   : > { %v298_v63 = vpop.permute.xlu2 %297 }
  0x90   : > { %v273_v44 = vpop.permute.xlu0 %272  ;;  %v278_v46 = vpop.permute.xlu1 %277 }
  0x93   : > { %v313_v9 = vpop.permute.xlu2 %312 }
  0x98   : > { %v288_v47 = vpop.permute.xlu0 %287  ;;  %v293_v53 = vpop.permute.xlu1 %292 }
  0x9c   : > { %v386_v48 = vpop.f32.mrf.mxu0  ;;  %v398_v49 = vpop.f32.mrf.mxu1 }
  0x9d   : > { %v387_v50 = vadd.f32 %v386_v48, %v243_v39  ;;  %v399_v51 = vadd.f32 %v398_v49, %v263_v42 }
  0x9f   : > { %435 = vst.msk [vmem:[%s793_s18] sm:$0xff] %vm434_vm1, %v387_v50 }
  0xa0   : > { %439 = vst.msk [vmem:[%s793_s18 + $0x20] sm:$0xff] %vm434_vm1, %v399_v51  ;;  %v303_v54 = vpop.permute.xlu0 %302  ;;  %v308_v0 = vpop.permute.xlu1 %307 }
  0xa3   : > { %v410_v55 = vpop.f32.mrf.mxu2  ;;  %v422_v56 = vpop.f32.mrf.mxu3 }
  0xa4   : > { %v411_v57 = vadd.f32 %v410_v55, %v283_v52  ;;  %v423_v58 = vadd.f32 %v422_v56, %v303_v54  ;;  %v389_v59 = vpop.f32.mrf.mxu0  ;;  %v401_v60 = vpop.f32.mrf.mxu1 }
  0xa5   : > { %v390_v61 = vadd.f32 %v389_v59, %v248_v41  ;;  %v402_v62 = vadd.f32 %v401_v60, %v268_v45 }
  0xa6   : > { %443 = vst.msk [vmem:[%s793_s18 + $0x40] sm:$0xff] %vm434_vm1, %v411_v57 }
  0xa7   : > { %447 = vst.msk [vmem:[%s793_s18 + $0x60] sm:$0xff] %vm434_vm1, %v423_v58 }
  0xa8   : > { %436 = vst.msk [vmem:[%s793_s18 + $0x8] sm:$0xff] %vm434_vm1, %v390_v61  ;;  %v318_v18 = vpop.permute.xlu0 %317 }
  0xa9   : > { %440 = vst.msk [vmem:[%s793_s18 + $0x28] sm:$0xff] %vm434_vm1, %v402_v62 }
  0xab   : > { %v413_v1 = vpop.f32.mrf.mxu2  ;;  %v425_v2 = vpop.f32.mrf.mxu3 }
  0xac   : > { %v414_v3 = vadd.f32 %v413_v1, %v288_v47  ;;  %v426_v4 = vadd.f32 %v425_v2, %v308_v0  ;;  %v392_v5 = vpop.f32.mrf.mxu0  ;;  %v404_v6 = vpop.f32.mrf.mxu1 }
  0xad   : > { %v393_v7 = vadd.f32 %v392_v5, %v253_v40  ;;  %v405_v8 = vadd.f32 %v404_v6, %v273_v44 }
  0xae   : > { %444 = vst.msk [vmem:[%s793_s18 + $0x48] sm:$0xff] %vm434_vm1, %v414_v3 }
  0xaf   : > { %448 = vst.msk [vmem:[%s793_s18 + $0x68] sm:$0xff] %vm434_vm1, %v426_v4 }
  0xb0   : > { %437 = vst.msk [vmem:[%s793_s18 + $0x10] sm:$0xff] %vm434_vm1, %v393_v7 }
  0xb1   : > { %441 = vst.msk [vmem:[%s793_s18 + $0x30] sm:$0xff] %vm434_vm1, %v405_v8 }
  0xb3   : > { %v416_v10 = vpop.f32.mrf.mxu2  ;;  %v428_v11 = vpop.f32.mrf.mxu3 }
  0xb4   : > { %v417_v12 = vadd.f32 %v416_v10, %v293_v53  ;;  %v429_v13 = vadd.f32 %v428_v11, %v313_v9  ;;  %v395_v14 = vpop.f32.mrf.mxu0  ;;  %v407_v15 = vpop.f32.mrf.mxu1 }
  0xb5   : > { %v396_v16 = vadd.f32 %v395_v14, %v258_v43  ;;  %v408_v17 = vadd.f32 %v407_v15, %v278_v46 }
  0xb6   : > { %445 = vst.msk [vmem:[%s793_s18 + $0x50] sm:$0xff] %vm434_vm1, %v417_v12 }
  0xb7   : > { %449 = vst.msk [vmem:[%s793_s18 + $0x70] sm:$0xff] %vm434_vm1, %v429_v13 }
  0xb8   : > { %438 = vst.msk [vmem:[%s793_s18 + $0x18] sm:$0xff] %vm434_vm1, %v396_v16 }
  0xb9   : > { %442 = vst.msk [vmem:[%s793_s18 + $0x38] sm:$0xff] %vm434_vm1, %v408_v17 }
  0xbb   : > { %v419_v19 = vpop.f32.mrf.mxu2  ;;  %v431_v20 = vpop.f32.mrf.mxu3 }
  0xbc   : > { %v420_v21 = vadd.f32 %v419_v19, %v298_v63  ;;  %v432_v22 = vadd.f32 %v431_v20, %v318_v18 }
  0xbe   : > { %446 = vst.msk [vmem:[%s793_s18 + $0x58] sm:$0xff] %vm434_vm1, %v420_v21 }
  0xbf   : > { %450 = vst.msk [vmem:[%s793_s18 + $0x78] sm:$0xff] %vm434_vm1, %v432_v22 }
  0xc0 PF: > { %s13_s14 = sadd.s32 1, %s630_s14   ;;  %s840_s12 = smov %s626_s13 }
  0xc1   : > { %p10_p5 = scmp.ge.s32.totalorder %s13_s14, 4   ;;  %s841_s13 = smov %s843_s15 }
  0xc3   :  { %12 = sbr.rel (!%p10_p5) target bundleno = 2 (0x2), region = 62 }

</bundles_post_ra>
